<compile_context>
chip_gen: v7x
topology: tpu7x:2x2x1
jax: 0.10.0
libtpu: 0.0.40
codegen_flags: <defaults>
</compile_context>

<pallas_src>
import functools

import jax
import jax.numpy as jnp
import numpy as np
from jax.experimental import pallas as pl
from jax.experimental.pallas import tpu as pltpu

SCALER = 20.0     # self.scaler in FewShotSeg.__init__
_EPS_COS = 1e-8   # F.cosine_similarity default eps
_LANE = 128
# Per-input-buffer VMEM budget.  BlockSpec double-buffers each input, so
# 4 MiB/buffer keeps every kernel comfortably inside the default scoped-VMEM
# limit on v5e/v6e (32/128 MiB) and v7x (32/64 MiB).
_TILE_BYTES = 4 * 1024 * 1024


def _round_up(x, m):
    return (x + m - 1) // m * m


def _pick_tile(fhw, c_pad, itemsize=4):
    """HW (lane) tile size + padded HW extent.

    Prefer the largest multiple of 128 that (a) keeps one [c_pad, tile] f32
    block under _TILE_BYTES and (b) divides fhw exactly, so the wrapper never
    pads (a pad is an extra full HBM copy and these kernels are HBM-bound)."""
    max_tile = max(_LANE, (_TILE_BYTES // (c_pad * itemsize)) // _LANE * _LANE)
    max_tile = min(max_tile, 2048)
    if fhw % _LANE == 0:
        for t in range(min(max_tile, fhw), 0, -_LANE):
            if fhw % t == 0:
                return t, fhw
    tile = min(max_tile, _round_up(fhw, _LANE))
    return tile, _round_up(fhw, tile)


def _pad_last2(x, d1, d2):
    p1, p2 = d1 - x.shape[-2], d2 - x.shape[-1]
    if p1 == 0 and p2 == 0:
        return x
    return jnp.pad(x, ((0, 0), (0, p1), (0, p2)))


# ----------------------------------------------------------------------------
# Pallas kernel 1: fused getFeatures (masked average pooling) + getPrototype
# ----------------------------------------------------------------------------
def _prototype_kernel(fts_ref, mask_ref, proto_ref, num_acc, den_acc,
                      *, inv_n_shots):
    # grid = (n_shots, n_hw_tiles); t is the innermost (fastest) axis.
    # Output block is resident for the whole grid (constant index map) and
    # accumulates the shot average; VMEM scratch accumulates the per-shot
    # numerator/denominator over HW tiles.
    shot = pl.program_id(0)
    t = pl.program_id(1)

    @pl.when(jnp.logical_and(shot == 0, t == 0))
    def _init_output():
        proto_ref[...] = jnp.zeros_like(proto_ref)

    @pl.when(t == 0)
    def _init_shot_acc():
        num_acc[...] = jnp.zeros_like(num_acc)
        den_acc[...] = jnp.zeros_like(den_acc)

    fts = fts_ref[0]                                          # [C, TILE]
    m = mask_ref[0]                                           # [1, TILE]
    num_acc[...] += jnp.sum(fts * m, axis=-1, keepdims=True)  # [C, 1]
    den_acc[...] += jnp.sum(m, axis=-1, keepdims=True)        # [1, 1]

    @pl.when(t == pl.num_programs(1) - 1)
    def _finalize_shot():
        shot_proto = num_acc[...] / (den_acc[...] + 1e-5)     # [C, 1]
        proto_ref[...] += (shot_proto * inv_n_shots)[None]    # [1, C, 1]


def prototype_pool(fts_scf, mask_adj_s1f):
    """fts_scf: [n_shots, C, FHW]; mask_adj_s1f: [n_shots, 1, FHW]
    (interpolation-adjoint mask weights).  Returns prototype [1, C_pad, 1]."""
    s, c, fhw = fts_scf.shape
    c_pad = _round_up(c, 8)
    tile, fhw_pad = _pick_tile(fhw, c_pad)
    fts = _pad_last2(fts_scf.astype(jnp.float32), c_pad, fhw_pad)
    mask = _pad_last2(mask_adj_s1f.astype(jnp.float32), 1, fhw_pad)

    return pl.pallas_call(
        functools.partial(_prototype_kernel, inv_n_shots=1.0 / s),
        out_shape=jax.ShapeDtypeStruct((1, c_pad, 1), jnp.float32),
        grid_spec=pltpu.PrefetchScalarGridSpec(
            num_scalar_prefetch=0,
            grid=(s, fhw_pad // tile),
            in_specs=[pl.BlockSpec((1, c_pad, tile), lambda s_, t: (s_, 0, t)),
                      pl.BlockSpec((1, 1, tile), lambda s_, t: (s_, 0, t))],
            out_specs=pl.BlockSpec((1, c_pad, 1), lambda s_, t: (0, 0, 0)),
            scratch_shapes=[pltpu.VMEM((c_pad, 1), jnp.float32),
                            pltpu.VMEM((1, 1), jnp.float32)]),
        compiler_params=pltpu.CompilerParams(
            # both axes accumulate into resident state -> "arbitrary"
            dimension_semantics=("arbitrary", "arbitrary")),
    )(fts, mask)


# ----------------------------------------------------------------------------
# Pallas kernel 2: getPred -- fused cosine similarity + threshold sigmoid
#   sim  = -cos(fts, proto) * 20
#   pred = 1 - sigmoid(0.5*(sim - thresh)) == sigmoid(10*cos + 0.5*thresh)
# ----------------------------------------------------------------------------
def _get_pred_kernel(fts_ref, proto_ref, thresh_ref, out_ref):
    fts = fts_ref[0]                                          # [C, TILE]
    proto = proto_ref[0]                                      # [C, 1]
    thresh = thresh_ref[0, 0]                                 # scalar (SMEM)

    dot = jnp.sum(fts * proto, axis=0, keepdims=True)         # [1, TILE]
    fn2 = jnp.sum(fts * fts, axis=0, keepdims=True)           # [1, TILE]
    pn2 = jnp.sum(proto * proto, axis=0, keepdims=True)       # [1, 1]
    eps2 = _EPS_COS * _EPS_COS
    inv_fn = jax.lax.rsqrt(jnp.maximum(fn2, eps2))            # 1/max(|f|,eps) (EUP)
    inv_pn = jax.lax.rsqrt(jnp.maximum(pn2, eps2))            # 1/max(|p|,eps)
    cos = dot * inv_fn * inv_pn
    out_ref[...] = jax.nn.sigmoid((0.5 * SCALER) * cos + 0.5 * thresh)[None]


def get_pred(fts_qcf, proto, thresh_scalar):
    """fts_qcf: [n_q, C, FHW]; proto: [1, C_pad, 1]; thresh: scalar.
    Returns pred [n_q, FHW] f32."""
    q, c, fhw = fts_qcf.shape
    c_pad = proto.shape[1]
    tile, fhw_pad = _pick_tile(fhw, c_pad)
    fts = _pad_last2(fts_qcf.astype(jnp.float32), c_pad, fhw_pad)
    thresh = jnp.asarray(thresh_scalar, jnp.float32).reshape(1, 1)

    out = pl.pallas_call(
        _get_pred_kernel,
        out_shape=jax.ShapeDtypeStruct((q, 1, fhw_pad), jnp.float32),
        grid_spec=pltpu.PrefetchScalarGridSpec(
            num_scalar_prefetch=0,
            grid=(q, fhw_pad // tile),
            in_specs=[pl.BlockSpec((1, c_pad, tile), lambda q_, t: (q_, 0, t)),
                      pl.BlockSpec((1, c_pad, 1), lambda q_, t: (0, 0, 0)),
                      pl.BlockSpec(memory_space=pltpu.MemorySpace.SMEM)],
            out_specs=pl.BlockSpec((1, 1, tile), lambda q_, t: (q_, 0, t))),
        compiler_params=pltpu.CompilerParams(
            # independent output tiles -> both axes split across TCs (v7x)
            dimension_semantics=("parallel", "parallel")),
    )(fts, proto, thresh)
    return out[:, 0, :fhw]


# ----------------------------------------------------------------------------
# Plain-JAX glue
# ----------------------------------------------------------------------------
def _interp_matrix(out_size, in_size):
    """Row-stochastic matrix W [out, in] of the align_corners=True bilinear
    resize in->out along one axis (upsample(x) = W @ x)."""
    if out_size == 1:
        pos = jnp.zeros((1,), jnp.float32)
    else:
        pos = jnp.linspace(0.0, float(in_size - 1), out_size)
    lo = jnp.clip(jnp.floor(pos).astype(jnp.int32), 0, in_size - 1)
    hi = jnp.clip(lo + 1, 0, in_size - 1)
    w = (pos - lo.astype(jnp.float32))[:, None]
    cols = jnp.arange(in_size)[None, :]
    return ((cols == lo[:, None]) * (1.0 - w)
            + (cols == hi[:, None]) * w).astype(jnp.float32)


def _resize_axis_ac(x, axis, out_size):
    """1-D linear resize matching PyTorch align_corners=True."""
    in_size = x.shape[axis]
    if out_size == in_size:
        return x
    if out_size == 1:
        pos = jnp.zeros((1,), jnp.float32)
    else:
        pos = jnp.linspace(0.0, float(in_size - 1), out_size)
    lo = jnp.clip(jnp.floor(pos).astype(jnp.int32), 0, in_size - 1)
    hi = jnp.clip(lo + 1, 0, in_size - 1)
    w = pos - lo.astype(jnp.float32)
    xl = jnp.take(x, lo, axis=axis)
    xh = jnp.take(x, hi, axis=axis)
    shp = [1] * x.ndim
    shp[axis] = out_size
    w = w.reshape(shp)
    return xl * (1.0 - w) + xh * w


def interpolate_bilinear_ac(x, size):
    """F.interpolate(x, size, mode='bilinear', align_corners=True) on NCHW."""
    return _resize_axis_ac(_resize_axis_ac(x, -2, size[0]), -1, size[1])


def make_params(key, c_feat=32):
    w_proj = jax.random.normal(key, (3, c_feat), jnp.float32) * 0.1
    return {"w_proj": w_proj}


# TODO(synk): Res101Encoder is an external backbone not defined in the provided
# source; replaced by a deterministic stride-2 1x1-conv + ReLU stand-in.
def encoder(imgs_nchw, params):
    x = imgs_nchw[:, :, ::2, ::2]                                    # stride-2
    fts = jnp.einsum("nchw,cd->ndhw", x, params["w_proj"])           # [N,C,h,w]
    fts = jax.nn.relu(fts)
    tao = jnp.tanh(jnp.mean(fts, axis=(1, 2, 3)))[:, None]           # [N, 1]
    return fts, tao


@functools.partial(jax.jit, static_argnames=("img_h", "img_w"))
def _zero_mask_episode(s_fts, mask, q_fts, thresh, *, img_h, img_w):
    """One episode of the empty-support-mask branch (the executed path).
    s_fts: [n_shots, C, fh, fw], mask: [n_shots, H, W], q_fts: [n_q, C, fh, fw].
    Returns preds [n_q, 1+n_ways, H, W]   (n_ways == 1)."""
    n_shots, c, fh, fw = s_fts.shape
    n_q = q_fts.shape[0]
    # Bilinear (fh,fw)->(H,W) interpolation matrices (align_corners=True);
    # static shapes -> constant-folded at compile time.
    w_y = _interp_matrix(img_h, fh)                           # [H, fh]
    w_x = _interp_matrix(img_w, fw)                           # [W, fw]
    # getFeatures' align_corners=True upsample is linear, so pooling the
    # upsampled features against `mask` equals pooling the raw feature map
    # against the interpolation-adjoint  W_y^T @ mask @ W_x  (same mask sum).
    mask_adj = jnp.einsum("hf,shw,wg->sfg", w_y, mask.astype(jnp.float32), w_x)
    proto = prototype_pool(s_fts.reshape(n_shots, c, fh * fw),
                           mask_adj.reshape(n_shots, 1, fh * fw))
    pred = get_pred(q_fts.reshape(n_q, c, fh * fw), proto, thresh)
    qry_pred = pred.reshape(n_q, 1, fh, fw)                   # n_ways == 1
    preds = interpolate_bilinear_ac(qry_pred, (img_h, img_w))
    return jnp.concatenate([1.0 - preds, preds], axis=1)


def fewshot_seg_forward(supp_imgs, supp_mask, qry_imgs, params, train=False):
    n_ways = len(supp_imgs)
    n_shots = len(supp_imgs[0])
    n_queries = len(qry_imgs)
    assert n_ways == 1 and n_queries == 1
    qry_bs = qry_imgs[0].shape[0]
    supp_bs = supp_imgs[0][0].shape[0]
    img_size = supp_imgs[0][0].shape[-2:]

    supp_mask_t = jnp.stack([jnp.stack(way, axis=0) for way in supp_mask], axis=0)
    supp_mask_t = supp_mask_t.reshape(supp_bs, n_ways, n_shots, *img_size)

    imgs_concat = jnp.concatenate(
        [jnp.concatenate(way, axis=0) for way in supp_imgs]
        + [jnp.concatenate(qry_imgs, axis=0)], axis=0)

    img_fts, tao = encoder(imgs_concat, params)
    c_feat = img_fts.shape[1]
    fh, fw = img_fts.shape[-2:]
    supp_fts = img_fts[: n_ways * n_shots * supp_bs].reshape(
        supp_bs, n_ways, n_shots, c_feat, fh, fw)
    qry_fts = img_fts[n_ways * n_shots * supp_bs:].reshape(
        qry_bs, n_queries, c_feat, fh, fw)
    t = tao[n_ways * n_shots * supp_bs:]                      # [qry_bs, 1]

    # Single device->host sync for ALL episode branch decisions (the non-empty
    # mask GMRD branch cannot be lax.cond'd because it is not implemented).
    mask_sums = np.asarray(jax.device_get(
        jnp.sum(supp_mask_t[:, 0], axis=(1, 2, 3))))

    align_loss = jnp.zeros((1,), jnp.float32)
    outputs = []
    for epi in range(supp_bs):
        if float(mask_sums[epi]) == 0.0:
            # ---- masked-average-pooling prototype branch (Pallas hot path) ----
            preds = _zero_mask_episode(
                supp_fts[epi, 0], supp_mask_t[epi, 0], qry_fts[epi],
                t[0, 0], img_h=img_size[0], img_w=img_size[1])
            outputs.append(preds)
            if train:
                # TODO(synk): alignLoss (training-time NLL loss) not implemented.
                pass
        else:
            # TODO(synk): GMRD branch requires MLP/Decoder (undefined in source),
            # cv2 erode/dilate and random.sample prototype selection.
            raise NotImplementedError("GMRD (non-empty support mask) branch")

    output = jnp.stack(outputs, axis=1)                # [n_q, supp_bs, 1+ways, H, W]
    output = output.reshape(-1, *output.shape[2:])     # [n_q*supp_bs, 1+ways, H, W]
    return output, align_loss / supp_bs


# ----------------------------------------------------------------------------
if __name__ == "__main__":
    key = jax.random.PRNGKey(0)
    H = W = 64
    C_FEAT = 32
    n_ways, n_shots, n_queries = 1, 2, 1
    supp_bs = qry_bs = 1

    keys = jax.random.split(key, n_shots + 2)
    supp_imgs = [[jax.random.normal(keys[i], (supp_bs, 3, H, W), jnp.float32)
                  for i in range(n_shots)]]
    supp_mask = [[jnp.zeros((supp_bs, H, W), jnp.float32)
                  for _ in range(n_shots)]]                  # all-zero -> pooled branch
    qry_imgs = [jax.random.normal(keys[n_shots], (qry_bs, 3, H, W), jnp.float32)]
    params = make_params(keys[n_shots + 1], C_FEAT)

    output, align_loss = fewshot_seg_forward(supp_imgs, supp_mask, qry_imgs, params)
    output, align_loss = jax.block_until_ready((output, align_loss))

    assert output.shape == (qry_bs * supp_bs, 1 + n_ways, H, W), output.shape
    assert bool(jnp.all(jnp.isfinite(output)))
    # per-pixel (1-p, p) pair must sum to 1
    assert bool(jnp.allclose(jnp.sum(output, axis=1), 1.0, atol=1e-5))
    print("KERNEL_OK")
</pallas_src>

<mosaic_0001>
module attributes {stable_mosaic.version = 11 : i64} {
  func.func @_prototype_kernel(%arg0: i32, %arg1: i32, %arg2: memref<1x32x1024xf32, #tpu.memory_space<vmem>>, %arg3: memref<1x1x1024xf32, #tpu.memory_space<vmem>>, %arg4: memref<1x32x1xf32, #tpu.memory_space<vmem>>, %arg5: memref<32x1xf32, #tpu.memory_space<vmem>>, %arg6: memref<1x1xf32, #tpu.memory_space<vmem>>) attributes {dimension_semantics = [#tpu.dimension_semantics<arbitrary>, #tpu.dimension_semantics<arbitrary>], iteration_bounds = array<i64: 2, 1>, scalar_prefetch = 0 : i64, scratch_operands = 2 : i64, tpu.core_type = #tpu.core_type<tc>, window_params = [{transform_indices = @transform_0, window_bounds = array<i64: 1, 32, 1024>}, {transform_indices = @transform_1, window_bounds = array<i64: 1, 1, 1024>}, {pipeline_mode = #tpu.pipeline_mode<synchronous>, transform_indices = @transform_2, window_bounds = array<i64: 1, 32, 1>}]} {
    %c0_i32 = arith.constant 0 : i32
    %0 = arith.cmpi eq, %arg0, %c0_i32 : i32
    %c0_i32_0 = arith.constant 0 : i32
    %1 = arith.cmpi eq, %arg1, %c0_i32_0 : i32
    %2 = arith.andi %0, %1 : i1
    %3 = arith.extui %2 : i1 to i32
    %c0_i32_1 = arith.constant 0 : i32
    %4 = arith.cmpi ne, %3, %c0_i32_1 : i32
    scf.if %4 {
      %cst_20 = arith.constant 0.000000e+00 : f32
      %27 = vector.broadcast %cst_20 : f32 to vector<1x32x1xf32>
      %c0_21 = arith.constant 0 : index
      %c0_22 = arith.constant 0 : index
      %c0_23 = arith.constant 0 : index
      %28 = vector.load %arg4[%c0_21, %c0_22, %c0_23] : memref<1x32x1xf32, #tpu.memory_space<vmem>>, vector<1x32x1xf32>
      tpu.vector_store %arg4[%c0_21, %c0_22, %c0_23], %27 {strides = array<i32>} : memref<1x32x1xf32, #tpu.memory_space<vmem>>, vector<1x32x1xf32>,
    } else {
    }
    %c0_i32_2 = arith.constant 0 : i32
    %5 = arith.cmpi eq, %arg1, %c0_i32_2 : i32
    %6 = arith.extui %5 : i1 to i32
    %c0_i32_3 = arith.constant 0 : i32
    %7 = arith.cmpi ne, %6, %c0_i32_3 : i32
    scf.if %7 {
      %cst_20 = arith.constant 0.000000e+00 : f32
      %27 = vector.broadcast %cst_20 : f32 to vector<32x1xf32>
      %c0_21 = arith.constant 0 : index
      %c0_22 = arith.constant 0 : index
      %28 = vector.load %arg5[%c0_21, %c0_22] : memref<32x1xf32, #tpu.memory_space<vmem>>, vector<32x1xf32>
      tpu.vector_store %arg5[%c0_21, %c0_22], %27 {strides = array<i32>} : memref<32x1xf32, #tpu.memory_space<vmem>>, vector<32x1xf32>,
      %cst_23 = arith.constant 0.000000e+00 : f32
      %29 = vector.broadcast %cst_23 : f32 to vector<1x1xf32>
      %c0_24 = arith.constant 0 : index
      %c0_25 = arith.constant 0 : index
      %30 = vector.load %arg6[%c0_24, %c0_25] : memref<1x1xf32, #tpu.memory_space<vmem>>, vector<1x1xf32>
      tpu.vector_store %arg6[%c0_24, %c0_25], %29 {strides = array<i32>} : memref<1x1xf32, #tpu.memory_space<vmem>>, vector<1x1xf32>,
    } else {
    }
    %c0 = arith.constant 0 : index
    %c0_4 = arith.constant 0 : index
    %c0_5 = arith.constant 0 : index
    %8 = vector.load %arg2[%c0, %c0_4, %c0_5] : memref<1x32x1024xf32, #tpu.memory_space<vmem>>, vector<1x32x1024xf32>
    %9 = vector.shape_cast %8 : vector<1x32x1024xf32> to vector<32x1024xf32>
    %c0_6 = arith.constant 0 : index
    %c0_7 = arith.constant 0 : index
    %c0_8 = arith.constant 0 : index
    %10 = vector.load %arg3[%c0_6, %c0_7, %c0_8] : memref<1x1x1024xf32, #tpu.memory_space<vmem>>, vector<1x1x1024xf32>
    %11 = vector.shape_cast %10 : vector<1x1x1024xf32> to vector<1x1024xf32>
    %c0_9 = arith.constant 0 : index
    %c0_10 = arith.constant 0 : index
    %12 = vector.load %arg5[%c0_9, %c0_10] : memref<32x1xf32, #tpu.memory_space<vmem>>, vector<32x1xf32>
    %13 = vector.broadcast %11 : vector<1x1024xf32> to vector<32x1024xf32>
    %14 = arith.mulf %9, %13 : vector<32x1024xf32>
    %cst = arith.constant dense<0.000000e+00> : vector<32xf32>
    %15 = vector.multi_reduction <add>, %14, %cst [1] : vector<32x1024xf32> to vector<32xf32>
    %16 = vector.shape_cast %15 : vector<32xf32> to vector<32x1xf32>
    %17 = arith.addf %12, %16 : vector<32x1xf32>
    %c0_11 = arith.constant 0 : index
    %c0_12 = arith.constant 0 : index
    %18 = vector.load %arg5[%c0_11, %c0_12] : memref<32x1xf32, #tpu.memory_space<vmem>>, vector<32x1xf32>
    tpu.vector_store %arg5[%c0_11, %c0_12], %17 {strides = array<i32>} : memref<32x1xf32, #tpu.memory_space<vmem>>, vector<32x1xf32>,
    %c0_13 = arith.constant 0 : index
    %c0_14 = arith.constant 0 : index
    %19 = vector.load %arg6[%c0_13, %c0_14] : memref<1x1xf32, #tpu.memory_space<vmem>>, vector<1x1xf32>
    %cst_15 = arith.constant dense<0.000000e+00> : vector<1xf32>
    %20 = vector.multi_reduction <add>, %11, %cst_15 [1] : vector<1x1024xf32> to vector<1xf32>
    %21 = vector.shape_cast %20 : vector<1xf32> to vector<1x1xf32>
    %22 = arith.addf %19, %21 : vector<1x1xf32>
    %c0_16 = arith.constant 0 : index
    %c0_17 = arith.constant 0 : index
    %23 = vector.load %arg6[%c0_16, %c0_17] : memref<1x1xf32, #tpu.memory_space<vmem>>, vector<1x1xf32>
    tpu.vector_store %arg6[%c0_16, %c0_17], %22 {strides = array<i32>} : memref<1x1xf32, #tpu.memory_space<vmem>>, vector<1x1xf32>,
    %c0_i32_18 = arith.constant 0 : i32
    %24 = arith.cmpi eq, %arg1, %c0_i32_18 : i32
    %25 = arith.extui %24 : i1 to i32
    %c0_i32_19 = arith.constant 0 : i32
    %26 = arith.cmpi ne, %25, %c0_i32_19 : i32
    scf.if %26 {
      %c0_20 = arith.constant 0 : index
      %c0_21 = arith.constant 0 : index
      %27 = vector.load %arg5[%c0_20, %c0_21] : memref<32x1xf32, #tpu.memory_space<vmem>>, vector<32x1xf32>
      %c0_22 = arith.constant 0 : index
      %c0_23 = arith.constant 0 : index
      %28 = vector.load %arg6[%c0_22, %c0_23] : memref<1x1xf32, #tpu.memory_space<vmem>>, vector<1x1xf32>
      %cst_24 = arith.constant 9.99999974E-6 : f32
      %29 = vector.broadcast %cst_24 : f32 to vector<1x1xf32>
      %30 = arith.addf %28, %29 : vector<1x1xf32>
      %31 = vector.broadcast %30 : vector<1x1xf32> to vector<32x1xf32>
      %32 = arith.divf %27, %31 : vector<32x1xf32>
      %c0_25 = arith.constant 0 : index
      %c0_26 = arith.constant 0 : index
      %c0_27 = arith.constant 0 : index
      %33 = vector.load %arg4[%c0_25, %c0_26, %c0_27] : memref<1x32x1xf32, #tpu.memory_space<vmem>>, vector<1x32x1xf32>
      %cst_28 = arith.constant 5.000000e-01 : f32
      %34 = vector.broadcast %cst_28 : f32 to vector<32x1xf32>
      %35 = arith.mulf %32, %34 : vector<32x1xf32>
      %36 = vector.shape_cast %35 : vector<32x1xf32> to vector<1x32x1xf32>
      %37 = arith.addf %33, %36 : vector<1x32x1xf32>
      %c0_29 = arith.constant 0 : index
      %c0_30 = arith.constant 0 : index
      %c0_31 = arith.constant 0 : index
      %38 = vector.load %arg4[%c0_29, %c0_30, %c0_31] : memref<1x32x1xf32, #tpu.memory_space<vmem>>, vector<1x32x1xf32>
      tpu.vector_store %arg4[%c0_29, %c0_30, %c0_31], %37 {strides = array<i32>} : memref<1x32x1xf32, #tpu.memory_space<vmem>>, vector<1x32x1xf32>,
    } else {
    }
    return
  }
  func.func @transform_0(%arg0: i32, %arg1: i32) -> (i32, i32, i32) {
    %c0_i32 = arith.constant 0 : i32
    %c0_i32_0 = arith.constant 0 : i32
    return %arg0, %c0_i32, %arg1 : i32, i32, i32
  }
  func.func @transform_1(%arg0: i32, %arg1: i32) -> (i32, i32, i32) {
    %c0_i32 = arith.constant 0 : i32
    %c0_i32_0 = arith.constant 0 : i32
    return %arg0, %c0_i32, %arg1 : i32, i32, i32
  }
  func.func @transform_2(%arg0: i32, %arg1: i32) -> (i32, i32, i32) {
    %c0_i32 = arith.constant 0 : i32
    %c0_i32_0 = arith.constant 0 : i32
    %c0_i32_1 = arith.constant 0 : i32
    %c0_i32_2 = arith.constant 0 : i32
    return %c0_i32, %c0_i32_0, %c0_i32_1 : i32, i32, i32
  }
}

module attributes {stable_mosaic.version = 11 : i64} {
  func.func @_get_pred_kernel(%arg0: i32, %arg1: i32, %arg2: memref<1x32x1024xf32, #tpu.memory_space<vmem>>, %arg3: memref<1x32x1xf32, #tpu.memory_space<vmem>>, %arg4: memref<1x1xf32, #tpu.memory_space<smem>>, %arg5: memref<1x1x1024xf32, #tpu.memory_space<vmem>>) attributes {dimension_semantics = [#tpu.dimension_semantics<parallel>, #tpu.dimension_semantics<parallel>], iteration_bounds = array<i64: 1, 1>, scalar_prefetch = 0 : i64, scratch_operands = 0 : i64, tpu.core_type = #tpu.core_type<tc>, window_params = [{transform_indices = @transform_0, window_bounds = array<i64: 1, 32, 1024>}, {pipeline_mode = #tpu.pipeline_mode<synchronous>, transform_indices = @transform_1, window_bounds = array<i64: 1, 32, 1>}, {transform_indices = @transform_2, window_bounds = array<i64: 1, 1>}, {transform_indices = @transform_3, window_bounds = array<i64: 1, 1, 1024>}]} {
    %c0 = arith.constant 0 : index
    %c0_0 = arith.constant 0 : index
    %c0_1 = arith.constant 0 : index
    %0 = vector.load %arg2[%c0, %c0_0, %c0_1] : memref<1x32x1024xf32, #tpu.memory_space<vmem>>, vector<1x32x1024xf32>
    %1 = vector.shape_cast %0 : vector<1x32x1024xf32> to vector<32x1024xf32>
    %c0_2 = arith.constant 0 : index
    %c0_3 = arith.constant 0 : index
    %c0_4 = arith.constant 0 : index
    %2 = vector.load %arg3[%c0_2, %c0_3, %c0_4] : memref<1x32x1xf32, #tpu.memory_space<vmem>>, vector<1x32x1xf32>
    %3 = vector.shape_cast %2 : vector<1x32x1xf32> to vector<32x1xf32>
    %c0_5 = arith.constant 0 : index
    %c0_6 = arith.constant 0 : index
    %4 = memref.load %arg4[%c0_5, %c0_6] : memref<1x1xf32, #tpu.memory_space<smem>>
    %5 = vector.broadcast %3 : vector<32x1xf32> to vector<32x1024xf32>
    %6 = arith.mulf %1, %5 : vector<32x1024xf32>
    %cst = arith.constant dense<0.000000e+00> : vector<1024xf32>
    %7 = vector.multi_reduction <add>, %6, %cst [0] : vector<32x1024xf32> to vector<1024xf32>
    %8 = vector.shape_cast %7 : vector<1024xf32> to vector<1x1024xf32>
    %9 = arith.mulf %1, %1 : vector<32x1024xf32>
    %cst_7 = arith.constant dense<0.000000e+00> : vector<1024xf32>
    %10 = vector.multi_reduction <add>, %9, %cst_7 [0] : vector<32x1024xf32> to vector<1024xf32>
    %11 = vector.shape_cast %10 : vector<1024xf32> to vector<1x1024xf32>
    %12 = arith.mulf %3, %3 : vector<32x1xf32>
    %cst_8 = arith.constant dense<0.000000e+00> : vector<1xf32>
    %13 = vector.multi_reduction <add>, %12, %cst_8 [0] : vector<32x1xf32> to vector<1xf32>
    %14 = vector.shape_cast %13 : vector<1xf32> to vector<1x1xf32>
    %cst_9 = arith.constant 1.000000e-16 : f32
    %15 = vector.broadcast %cst_9 : f32 to vector<1x1024xf32>
    %16 = arith.maximumf %11, %15 : vector<1x1024xf32>
    %17 = math.rsqrt %16 : vector<1x1024xf32>
    %cst_10 = arith.constant 1.000000e-16 : f32
    %18 = vector.broadcast %cst_10 : f32 to vector<1x1xf32>
    %19 = arith.maximumf %14, %18 : vector<1x1xf32>
    %20 = math.rsqrt %19 : vector<1x1xf32>
    %21 = arith.mulf %8, %17 : vector<1x1024xf32>
    %22 = vector.broadcast %20 : vector<1x1xf32> to vector<1x1024xf32>
    %23 = arith.mulf %21, %22 : vector<1x1024xf32>
    %cst_11 = arith.constant 1.000000e+01 : f32
    %24 = vector.broadcast %cst_11 : f32 to vector<1x1024xf32>
    %25 = arith.mulf %24, %23 : vector<1x1024xf32>
    %cst_12 = arith.constant 5.000000e-01 : f32
    %26 = arith.mulf %cst_12, %4 : f32
    %27 = vector.broadcast %26 : f32 to vector<1x1024xf32>
    %28 = arith.addf %25, %27 : vector<1x1024xf32>
    %29 = arith.negf %28 : vector<1x1024xf32>
    %30 = math.exp %29 : vector<1x1024xf32>
    %cst_13 = arith.constant 1.000000e+00 : f32
    %31 = vector.broadcast %cst_13 : f32 to vector<1x1024xf32>
    %32 = arith.addf %31, %30 : vector<1x1024xf32>
    %33 = arith.divf %31, %32 : vector<1x1024xf32>
    %34 = vector.shape_cast %33 : vector<1x1024xf32> to vector<1x1x1024xf32>
    %c0_14 = arith.constant 0 : index
    %c0_15 = arith.constant 0 : index
    %c0_16 = arith.constant 0 : index
    %35 = vector.load %arg5[%c0_14, %c0_15, %c0_16] : memref<1x1x1024xf32, #tpu.memory_space<vmem>>, vector<1x1x1024xf32>
    tpu.vector_store %arg5[%c0_14, %c0_15, %c0_16], %34 {strides = array<i32>} : memref<1x1x1024xf32, #tpu.memory_space<vmem>>, vector<1x1x1024xf32>,
    return
  }
  func.func @transform_0(%arg0: i32, %arg1: i32) -> (i32, i32, i32) {
    %c0_i32 = arith.constant 0 : i32
    %c0_i32_0 = arith.constant 0 : i32
    return %arg0, %c0_i32, %arg1 : i32, i32, i32
  }
  func.func @transform_1(%arg0: i32, %arg1: i32) -> (i32, i32, i32) {
    %c0_i32 = arith.constant 0 : i32
    %c0_i32_0 = arith.constant 0 : i32
    %c0_i32_1 = arith.constant 0 : i32
    %c0_i32_2 = arith.constant 0 : i32
    return %c0_i32, %c0_i32_0, %c0_i32_1 : i32, i32, i32
  }
  func.func @transform_2(%arg0: i32, %arg1: i32) -> (i32, i32) {
    %c0_i32 = arith.constant 0 : i32
    %c0_i32_0 = arith.constant 0 : i32
    %c0_i32_1 = arith.constant 0 : i32
    return %c0_i32, %c0_i32_0 : i32, i32
  }
  func.func @transform_3(%arg0: i32, %arg1: i32) -> (i32, i32, i32) {
    %c0_i32 = arith.constant 0 : i32
    %c0_i32_0 = arith.constant 0 : i32
    return %arg0, %c0_i32, %arg1 : i32, i32, i32
  }
}

</mosaic_0001>

<bundles_post_ra>
// kernel: _zero_mask_episode.2
= control target key start
LH: loop header
LB: loop body
LE: loop exit
PB: predicated region body
PF: predicated region fallthrough
CT: control target
= control target key end

     0   :  { %s562_s9 = smov 0   ;;  %s564_s10 = smov 0   ;;  %s757_s0 = inlined_call_operand.vmem [shape: f32[2,32,1024], index: 0, kind: input, shape index: {}]   ;;  %s758_s1 = inlined_call_operand.vmem [shape: f32[2,1,1024], index: 1, kind: input, shape index: {}]   ;;  %s759_s2 = inlined_call_operand.vmem [shape: f32[1,32,1], index: 2, kind: output, shape index: {}]  }
   0x1   :  { %s566_s11 = smov 0  }
   0x2 LB: > { %s24_s12 = sadd.s32 1, %s539_s10  ;;  %p484_p0 = scmp.ge.s32.totalorder %s543_s11, 1  ;;  %s543_s11 = sphi %s566_s11, %s12_s11   ;;  %s539_s10 = sphi %s564_s10, %s761_s10   ;;  %s535_s9 = sphi %s562_s9, %s760_s9  }
   0x3   : > { %p26_p1 = scmp.ge.s32.totalorder %s24_s12, 2  ;;  %p142_p2 = scmp.lt.s32.totalorder %s543_s11, 3 }
   0x5   : > { %s763_s12 = smov (%p26_p1, %s24_s12), 0  ;;  %p143_p3 = pnand %p484_p0, %p142_p2 }
   0x6   : > { %p172_p4 = scmp.lt.s32.totalorder (!%p143_p3), %s535_s9, 1  ;;  %p190_p5 = scmp.eq.s32.totalorder (!%p143_p3), %s535_s9, 0 }
   0x7   : > { %146 = sbr.rel (%p143_p3) target bundleno = 219 (0xdb), region = 28 }
   0xe   : > { %s765_s9 = smov (!%p172_p4, %s535_s9), 1  ;;  %195 = sbr.rel (!%p190_p5) target bundleno = 21 (0x15), region = 32 }
   0xf   : > { %s491_s13 = sshll.u32 %s765_s9, 8  ;;  %s487_s14 = sshll.u32 %s765_s9, 3  ;;  %vm196_vm0 = vcmask (%p190_p5), 7168   ;;  %v545_v0 = vmov (%p190_p5), 0.0  }
  0x10   : > { %s583_s17 = scalar_lea.vmem %s757_s0, %s491_s13  ;;  %s188_s20 = scalar_lea.vmem %s758_s1, %s487_s14  ;;  %197 = vst.msk [vmem:[%s759_s2] sm:$0xff] (%p190_p5), %vm196_vm0, %v545_v0  ;;  %198 = vst.msk [vmem:[%s759_s2 + $0x8] sm:$0xff] (%p190_p5), %vm196_vm0, %v545_v0 }
  0x11   : > { %199 = vst.msk [vmem:[%s759_s2 + $0x10] sm:$0xff] (%p190_p5), %vm196_vm0, %v545_v0  ;;  %200 = vst.msk [vmem:[%s759_s2 + $0x18] sm:$0xff] (%p190_p5), %vm196_vm0, %v545_v0 }
  0x15 PF: > { %v249_v1 = vlaneseq  ;;  %v243_v3 = vld [vmem:[%s188_s20] sm:$0xff]  ;;  %vm367_vm1 = vcmask 1040384   ;;  %v220_v17 = vld [vmem:[%s583_s17 + $0x48] sm:$0xff]  ;;  %v221_v18 = vld [vmem:[%s583_s17 + $0x50] sm:$0xff]  ;;  %vm209_vm2 = vcmask 0   ;;  %vm204_vm3 = vcmask 7168  }
  0x16   : > { %v219_v16 = vld [vmem:[%s583_s17 + $0x40] sm:$0xff]  ;;  %v222_v27 = vld [vmem:[%s583_s17 + $0x58] sm:$0xff]  ;;  %v212_v33 = vld [vmem:[%s583_s17 + $0x8] sm:$0xff] }
  0x17   : > { %v600_v2 = vshrl.u32 %v249_v1, 7  ;;  %v211_v28 = vld [vmem:[%s583_s17] sm:$0xff]  ;;  %v213_v34 = vld [vmem:[%s583_s17 + $0x10] sm:$0xff]  ;;  %v214_v40 = vld [vmem:[%s583_s17 + $0x18] sm:$0xff] }
  0x18   : > { %v223_v36 = vld [vmem:[%s583_s17 + $0x60] sm:$0xff]  ;;  %v224_v45 = vld [vmem:[%s583_s17 + $0x68] sm:$0xff]  ;;  %v229_v49 = vld [vmem:[%s583_s17 + $0x90] sm:$0xff] }
  0x19   : > { %v251_v4 = vsub.s32 0, %v600_v2  ;;  %v255_v5 = vsub.s32 1, %v600_v2  ;;  %v259_v6 = vsub.s32 2, %v600_v2  ;;  %v263_v7 = vsub.s32 3, %v600_v2  ;;  %v227_v42 = vld [vmem:[%s583_s17 + $0x80] sm:$0xff]  ;;  %v228_v48 = vld [vmem:[%s583_s17 + $0x88] sm:$0xff] }
  0x1a   : > { %v267_v8 = vsub.s32 4, %v600_v2  ;;  %v271_v9 = vsub.s32 5, %v600_v2  ;;  %v275_v10 = vsub.s32 6, %v600_v2  ;;  %v279_v11 = vsub.s32 7, %v600_v2  ;;  %v225_v52 = vld [vmem:[%s583_s17 + $0x70] sm:$0xff]  ;;  %v215_v55 = vld [vmem:[%s583_s17 + $0x20] sm:$0xff] }
  0x1b   : > { %v612_v12 = vrot.slane %v243_v3, %v251_v4  ;;  %v614_v13 = vrot.slane %v243_v3, %v255_v5  ;;  %v616_v14 = vrot.slane %v243_v3, %v259_v6  ;;  %v618_v15 = vrot.slane %v243_v3, %v263_v7  ;;  %v216_v57 = vld [vmem:[%s583_s17 + $0x28] sm:$0xff]  ;;  %v230_v60 = vld [vmem:[%s583_s17 + $0x98] sm:$0xff]  ;;  %v408_v2 = vld [vmem:[%s759_s2] sm:$0xff] }
  0x1c   : > { %v623_v19 = vrot.slane %v243_v3, %v267_v8  ;;  %v631_v23 = vrot.slane %v243_v3, %v271_v9  ;;  %v633_v24 = vrot.slane %v243_v3, %v275_v10  ;;  %v635_v25 = vrot.slane %v243_v3, %v279_v11  ;;  %v235_v3 = vld [vmem:[%s583_s17 + $0xc0] sm:$0xff]  ;;  %v236_v5 = vld [vmem:[%s583_s17 + $0xc8] sm:$0xff]  ;;  %v226_v7 = vld [vmem:[%s583_s17 + $0x78] sm:$0xff] }
  0x1d   : > { %v368_v20 = vsel %vm367_vm1, %v612_v12, 0.0  ;;  %v369_v21 = vsel %vm367_vm1, %v614_v13, 0.0  ;;  %v371_v22 = vsel %vm367_vm1, %v616_v14, 0.0  ;;  %v373_v29 = vsel %vm367_vm1, %v618_v15, 0.0  ;;  %v231_v11 = vld [vmem:[%s583_s17 + $0xa0] sm:$0xff] }
  0x1e   : > { %v370_v26 = vadd.f32 %v369_v21, %v368_v20  ;;  %v297_v30 = vmul.f32 %v612_v12, %v219_v16  ;;  %v298_v31 = vmul.f32 %v614_v13, %v220_v17  ;;  %v299_v32 = vmul.f32 %v616_v14, %v221_v18  ;;  %v217_v17 = vld [vmem:[%s583_s17 + $0x30] sm:$0xff] }
  0x1f   : > { %v375_v37 = vsel %vm367_vm1, %v623_v19, 0.0  ;;  %v300_v38 = vmul.f32 %v618_v15, %v222_v27  ;;  %v289_v41 = vmul.f32 %v612_v12, %v211_v28  ;;  %v377_v44 = vsel %vm367_vm1, %v631_v23, 0.0  ;;  %v232_v28 = vld [vmem:[%s583_s17 + $0xa8] sm:$0xff] }
  0x20   : > { %v372_v35 = vadd.f32 %v371_v22, %v370_v26  ;;  %v330_v39 = vadd.f32 %v298_v31, %v297_v30  ;;  %v290_v46 = vmul.f32 %v614_v13, %v212_v33  ;;  %v291_v47 = vmul.f32 %v616_v14, %v213_v34  ;;  %v237_v22 = vld [vmem:[%s583_s17 + $0xd0] sm:$0xff]  ;;  %v218_v33 = vld [vmem:[%s583_s17 + $0x38] sm:$0xff] }
  0x21   : > { %v379_v50 = vsel %vm367_vm1, %v633_v24, 0.0  ;;  %v381_v51 = vsel %vm367_vm1, %v635_v25, 0.0  ;;  %v301_v53 = vmul.f32 %v623_v19, %v223_v36  ;;  %v292_v58 = vmul.f32 %v618_v15, %v214_v40  ;;  %v238_v36 = vld [vmem:[%s583_s17 + $0xd8] sm:$0xff]  ;;  %v233_v40 = vld [vmem:[%s583_s17 + $0xb0] sm:$0xff] }
  0x22   : > { %v374_v43 = vadd.f32 %v373_v29, %v372_v35  ;;  %v331_v54 = vadd.f32 %v330_v39, %v299_v32  ;;  %v321_v59 = vadd.f32 %v290_v46, %v289_v41  ;;  %v305_v61 = vmul.f32 %v612_v12, %v227_v42  ;;  %v234_v46 = vld [vmem:[%s583_s17 + $0xb8] sm:$0xff] }
  0x23   : > { %v302_v62 = vmul.f32 %v631_v23, %v224_v45  ;;  %v306_v0 = vmul.f32 %v614_v13, %v228_v48  ;;  %v307_v1 = vmul.f32 %v616_v14, %v229_v49  ;;  %v303_v8 = vmul.f32 %v633_v24, %v225_v52 }
  0x24   : > { %v376_v56 = vadd.f32 %v375_v37, %v374_v43  ;;  %v332_v63 = vadd.f32 %v331_v54, %v300_v38  ;;  %v293_v9 = vmul.f32 %v623_v19, %v215_v55  ;;  %v322_v10 = vadd.f32 %v321_v59, %v291_v47  ;;  %v239_v43 = vld [vmem:[%s583_s17 + $0xe0] sm:$0xff] }
  0x25   : > { %v294_v18 = vmul.f32 %v631_v23, %v216_v57  ;;  %v308_v20 = vmul.f32 %v618_v15, %v230_v60  ;;  %v339_v21 = vadd.f32 %v306_v0, %v305_v61  ;;  %v313_v29 = vmul.f32 %v612_v12, %v235_v3  ;;  %v241_v57 = vld [vmem:[%s583_s17 + $0xf0] sm:$0xff]  ;;  %v242_v61 = vld [vmem:[%s583_s17 + $0xf8] sm:$0xff] }
  0x26   : > { %v378_v6 = vadd.f32 %v377_v44, %v376_v56  ;;  %v333_v16 = vadd.f32 %v332_v63, %v301_v53  ;;  %v323_v27 = vadd.f32 %v322_v10, %v292_v58  ;;  %v314_v30 = vmul.f32 %v614_v13, %v236_v5 }
  0x27   : > { %v304_v31 = vmul.f32 %v635_v25, %v226_v7  ;;  %v309_v34 = vmul.f32 %v623_v19, %v231_v11  ;;  %v340_v35 = vadd.f32 %v339_v21, %v307_v1  ;;  %v295_v38 = vmul.f32 %v633_v24, %v217_v17 }
  0x28   : > { %v380_v26 = vadd.f32 %v379_v50, %v378_v6  ;;  %v334_v32 = vadd.f32 %v333_v16, %v302_v62  ;;  %v324_v39 = vadd.f32 %v323_v27, %v293_v9  ;;  %v315_v12 = vmul.f32 %v616_v14, %v237_v22  ;;  %v240_v14 = vld [vmem:[%s583_s17 + $0xe8] sm:$0xff] }
  0x29   : > { %v310_v13 = vmul.f32 %v631_v23, %v232_v28  ;;  %v341_v42 = vadd.f32 %v340_v35, %v308_v20  ;;  %v296_v44 = vmul.f32 %v635_v25, %v218_v33  ;;  %v316_v47 = vmul.f32 %v618_v15, %v238_v36  ;;  %v409_v35 = vld [vmem:[%s759_s2 + $0x8] sm:$0xff] }
  0x2a   : > { %v382_v37 = vadd.f32 %v381_v51, %v380_v26  ;;  %v335_v41 = vadd.f32 %v334_v32, %v303_v8  ;;  %v325_v45 = vadd.f32 %v324_v39, %v294_v18  ;;  %v348_v48 = vadd.f32 %v314_v30, %v313_v29 }
  0x2b   : > { %v311_v50 = vmul.f32 %v633_v24, %v233_v40  ;;  %v342_v51 = vadd.f32 %v341_v42, %v309_v34  ;;  %v317_v53 = vmul.f32 %v623_v19, %v239_v43  ;;  %v312_v55 = vmul.f32 %v635_v25, %v234_v46  ;;  %v411_v40 = vld [vmem:[%s759_s2 + $0x18] sm:$0xff] }
  0x2c   : > { %383 = vadd.xlane.f32.xlu0 %v382_v37  ;;  %v336_v49 = vadd.f32 %v335_v41, %v304_v31  ;;  %v326_v52 = vadd.f32 %v325_v45, %v295_v38  ;;  %v349_v54 = vadd.f32 %v348_v48, %v315_v12  ;;  %v318_v59 = vmul.f32 %v631_v23, %v240_v14 }
  0x2d   : > { %v343_v56 = vadd.f32 %v342_v51, %v310_v13  ;;  %v319_v62 = vmul.f32 %v633_v24, %v241_v57  ;;  %v546_v0 = vmov 0.0   ;;  %v320_v1 = vmul.f32 %v635_v25, %v242_v61 }
  0x2e   : > { %337 = vadd.xlane.f32.xlu1 %v336_v49  ;;  %v327_v58 = vadd.f32 %v326_v52, %v296_v44  ;;  %v350_v15 = vadd.f32 %v349_v54, %v316_v47  ;;  %210 = vst.msk [vmem:[#allocation3] sm:$0x1] %vm209_vm2, %v546_v0 }
  0x2f   : > { %v344_v60 = vadd.f32 %v343_v56, %v311_v50  ;;  %206 = vst.msk [vmem:[#allocation2 + $0x8] sm:$0xff] %vm204_vm3, %v546_v0  ;;  %205 = vst.msk [vmem:[#allocation2] sm:$0xff] %vm204_vm3, %v546_v0 }
  0x30   : > { %328 = vadd.xlane.f32.xlu0 %v327_v58  ;;  %v351_v63 = vadd.f32 %v350_v15, %v317_v53  ;;  %207 = vst.msk [vmem:[#allocation2 + $0x10] sm:$0xff] %vm204_vm3, %v546_v0  ;;  %208 = vst.msk [vmem:[#allocation2 + $0x18] sm:$0xff] %vm204_vm3, %v546_v0 }
  0x31   : > { %v345_v19 = vadd.f32 %v344_v60, %v312_v55 }
  0x32   : > { %v352_v3 = vadd.f32 %v351_v63, %v318_v59 }
  0x33   : > { %346 = vadd.xlane.f32.xlu1 %v345_v19 }
  0x34   : > { %v353_v5 = vadd.f32 %v352_v3, %v319_v62 }
  0x35   : > { %v366_v23 = vld [vmem:[#allocation3] sm:$0x1] }
  0x36   : > { %v354_v6 = vadd.f32 %v353_v5, %v320_v1  ;;  %v245_v8 = vld [vmem:[#allocation2 + $0x8] sm:$0xff]  ;;  %v244_v10 = vld [vmem:[#allocation2] sm:$0xff] }
  0x37   : > { %v246_v17 = vld [vmem:[#allocation2 + $0x10] sm:$0xff]  ;;  %v247_v26 = vld [vmem:[#allocation2 + $0x18] sm:$0xff] }
  0x38   : > { %355 = vadd.xlane.f32.xlu0 %v354_v6 }
  0xb9   : > { %v384_v24 = vpop.xlane.xlu0 %383 }
  0xba   : > { %v385_v7 = vadd.f32 %v384_v24, %v366_v23 }
  0xbb   : > { %v338_v25 = vpop.xlane.xlu1 %337 }
  0xbc   : > { %387 = vst.msk [vmem:[#allocation3] sm:$0x1] %vm209_vm2, %v385_v7  ;;  %v358_v9 = vadd.f32 %v338_v25, %v245_v8 }
  0xbd   : > { %v329_v11 = vpop.xlane.xlu0 %328 }
  0xbe   : > { %363 = vst.msk [vmem:[#allocation2 + $0x8] sm:$0xff] %vm204_vm3, %v358_v9  ;;  %v357_v16 = vadd.f32 %v329_v11, %v244_v10 }
  0xc0   : > { %362 = vst.msk [vmem:[#allocation2] sm:$0xff] %vm204_vm3, %v357_v16  ;;  %v347_v18 = vpop.xlane.xlu1 %346 }
  0xc1   : > { %v359_v21 = vadd.f32 %v347_v18, %v246_v17 }
  0xc3   : > { %v395_v20 = vld [vmem:[#allocation3] sm:$0x1]  ;;  %364 = vst.msk [vmem:[#allocation2 + $0x10] sm:$0xff] %vm204_vm3, %v359_v21 }
  0xc4   : > { %v396_v22 = vadd.f32 1e-05, %v395_v20 }
  0xc5   : > { %v356_v28 = vpop.xlane.xlu0 %355  ;;  %v392_v33 = vld [vmem:[#allocation2 + $0x8] sm:$0xff] }
  0xc6   : > { %v401_v27 = vrot.slane %v396_v22, %v251_v4  ;;  %v360_v29 = vadd.f32 %v356_v28, %v247_v26  ;;  %v410_v4 = vld [vmem:[%s759_s2 + $0x10] sm:$0xff] }
  0xc7   : > { %v391_v34 = vld [vmem:[#allocation2] sm:$0xff] }
  0xc8   : > { %519 = vrcp.f32 %v401_v27  ;;  %365 = vst.msk [vmem:[#allocation2 + $0x18] sm:$0xff] %vm204_vm3, %v360_v29 }
  0xca   : > { %v393_v30 = vld [vmem:[#allocation2 + $0x10] sm:$0xff] }
  0xcf   : > { %v394_v31 = vld [vmem:[#allocation2 + $0x18] sm:$0xff] }
  0xd2   : > { %v520_v32 = vpop.eup %519 }
  0xd3   : > { %v405_v36 = vmul.f32 %v520_v32, %v392_v33  ;;  %v404_v37 = vmul.f32 %v520_v32, %v391_v34  ;;  %v406_v38 = vmul.f32 %v520_v32, %v393_v30  ;;  %v407_v39 = vmul.f32 %v520_v32, %v394_v31 }
  0xd5   : > { %v413_v12 = vmul.f32 0.5, %v405_v36  ;;  %v412_v41 = vmul.f32 0.5, %v404_v37  ;;  %v414_v13 = vmul.f32 0.5, %v406_v38  ;;  %v415_v42 = vmul.f32 0.5, %v407_v39 }
  0xd7   : > { %v417_v43 = vadd.f32 %v413_v12, %v409_v35  ;;  %v416_v44 = vadd.f32 %v412_v41, %v408_v2  ;;  %v418_v45 = vadd.f32 %v414_v13, %v410_v4  ;;  %v419_v46 = vadd.f32 %v415_v42, %v411_v40 }
  0xd9   : > { %421 = vst.msk [vmem:[%s759_s2 + $0x8] sm:$0xff] %vm204_vm3, %v417_v43  ;;  %420 = vst.msk [vmem:[%s759_s2] sm:$0xff] %vm204_vm3, %v416_v44 }
  0xda   : > { %422 = vst.msk [vmem:[%s759_s2 + $0x10] sm:$0xff] %vm204_vm3, %v418_v45  ;;  %423 = vst.msk [vmem:[%s759_s2 + $0x18] sm:$0xff] %vm204_vm3, %v419_v46 }
  0xdb PF: > { %s12_s11 = sadd.s32 1, %s543_s11   ;;  %s760_s9 = smov %s539_s10 }
  0xdc   : > { %p9_p6 = scmp.ge.s32.totalorder %s12_s11, 4   ;;  %s761_s10 = smov %s763_s12 }
  0xde   :  { %11 = sbr.rel (!%p9_p6) target bundleno = 2 (0x2), region = 69 }

// kernel: _zero_mask_episode.3
= control target key start
LH: loop header
LB: loop body
LE: loop exit
PB: predicated region body
PF: predicated region fallthrough
CT: control target
= control target key end

     0   :  { %v528_v0 = vmov 0   ;;  %vm284_vm0 = vcmask 7168   ;;  %s852_s1 = inlined_call_operand.vmem [shape: f32[1,32,1], index: 1, kind: input, shape index: {}]   ;;  %s853_s0 = inlined_call_operand.vmem [shape: f32[1,32,1024], index: 0, kind: input, shape index: {}]   ;;  %s854_s2 = inlined_call_operand.<no memory space> [shape: f32[1,1], index: 2, kind: input, shape index: {}]   ;;  %s855_s3 = inlined_call_operand.vmem [shape: f32[1,1,1024], index: 3, kind: output, shape index: {}]  }
   0x1   :  { %476 = vset.pattern.permute.xlu0 %v528_v0  ;;  %v47_v1 = vld [vmem:[%s852_s1] sm:$0xff]  ;;  %477 = vset.pattern.permute.xlu1 %v528_v0  ;;  %v49_v2 = vld [vmem:[%s852_s1 + $0x10] sm:$0xff]  ;;  %v48_v3 = vld [vmem:[%s852_s1 + $0x8] sm:$0xff]  ;;  %s345_s28 = smul.f32 0.5, %s854_s2 }
   0x2   :  { %54 = vperm.xlu0 %476, %v47_v1   ;;  %v280_v4 = vmul.f32 %v47_v1, %v47_v1  ;;  %64 = vperm.xlu1 %477, %v49_v2   ;;  %v282_v5 = vmul.f32 %v49_v2, %v49_v2  ;;  %v281_v6 = vmul.f32 %v48_v3, %v48_v3  ;;  %v50_v7 = vld [vmem:[%s852_s1 + $0x18] sm:$0xff]  ;;  %v569_v24 = vld [vmem:[%s853_s0] sm:$0xff]  ;;  %v579_v26 = vld [vmem:[%s853_s0 + $0x8] sm:$0xff] }
   0x3   :  { %v283_v8 = vmul.f32 %v50_v7, %v50_v7  ;;  %v574_v25 = vld [vmem:[%s853_s0 + $0x40] sm:$0xff]  ;;  %v584_v27 = vld [vmem:[%s853_s0 + $0x48] sm:$0xff]  ;;  %v589_v28 = vld [vmem:[%s853_s0 + $0x10] sm:$0xff]  ;;  %v176_v31 = vmul.f32 %v569_v24, %v569_v24  ;;  %v177_v35 = vmul.f32 %v579_v26, %v579_v26 }
   0x4   :  { %v285_v9 = vsel %vm284_vm0, %v280_v4, 0.0  ;;  %v288_v10 = vsel %vm284_vm0, %v282_v5, 0.0  ;;  %v286_v11 = vsel %vm284_vm0, %v281_v6, 0.0  ;;  %v594_v29 = vld [vmem:[%s853_s0 + $0x50] sm:$0xff]  ;;  %v599_v30 = vld [vmem:[%s853_s0 + $0x18] sm:$0xff]  ;;  %v184_v33 = vmul.f32 %v574_v25, %v574_v25  ;;  %v613_v34 = vld [vmem:[%s853_s0 + $0x20] sm:$0xff] }
   0x5   :  { %v287_v12 = vadd.f32 %v286_v11, %v285_v9  ;;  %v290_v13 = vsel %vm284_vm0, %v283_v8, 0.0  ;;  %v606_v32 = vld [vmem:[%s853_s0 + $0x58] sm:$0xff]  ;;  %v620_v36 = vld [vmem:[%s853_s0 + $0x80] sm:$0xff]  ;;  %v185_v38 = vmul.f32 %v584_v27, %v584_v27  ;;  %v632_v39 = vld [vmem:[%s853_s0 + $0x28] sm:$0xff]  ;;  %v178_v40 = vmul.f32 %v589_v28, %v589_v28 }
   0x6   :  { %59 = vperm.xlu0 %476, %v48_v3   ;;  %69 = vperm.xlu1 %477, %v50_v7   ;;  %v625_v37 = vld [vmem:[%s853_s0 + $0x60] sm:$0xff]  ;;  %v639_v41 = vld [vmem:[%s853_s0 + $0x88] sm:$0xff]  ;;  %v186_v43 = vmul.f32 %v594_v29, %v594_v29  ;;  %v651_v44 = vld [vmem:[%s853_s0 + $0x30] sm:$0xff]  ;;  %v179_v45 = vmul.f32 %v599_v30, %v599_v30  ;;  %v187_v48 = vmul.f32 %v606_v32, %v606_v32 }
   0x7   :  { %v289_v14 = vadd.f32 %v288_v10, %v287_v12  ;;  %v644_v42 = vld [vmem:[%s853_s0 + $0x68] sm:$0xff]  ;;  %v658_v46 = vld [vmem:[%s853_s0 + $0x90] sm:$0xff]  ;;  %v670_v49 = vld [vmem:[%s853_s0 + $0x38] sm:$0xff]  ;;  %v180_v50 = vmul.f32 %v613_v34, %v613_v34  ;;  %v192_v52 = vmul.f32 %v620_v36, %v620_v36  ;;  %v188_v54 = vmul.f32 %v625_v37, %v625_v37 }
   0x8   :  { %v663_v47 = vld [vmem:[%s853_s0 + $0x70] sm:$0xff]  ;;  %v677_v51 = vld [vmem:[%s853_s0 + $0x98] sm:$0xff]  ;;  %v208_v55 = vadd.f32 %v184_v33, %v176_v31  ;;  %v181_v56 = vmul.f32 %v632_v39, %v632_v39  ;;  %v693_v57 = vld [vmem:[%s853_s0 + $0xa0] sm:$0xff]  ;;  %v193_v58 = vmul.f32 %v639_v41, %v639_v41  ;;  %v189_v59 = vmul.f32 %v644_v42, %v644_v42 }
   0x9   :  { %v291_v15 = vadd.f32 %v290_v13, %v289_v14  ;;  %v684_v53 = vld [vmem:[%s853_s0 + $0x78] sm:$0xff]  ;;  %v702_v60 = vld [vmem:[%s853_s0 + $0xc0] sm:$0xff]  ;;  %v217_v61 = vadd.f32 %v185_v38, %v177_v35  ;;  %v182_v62 = vmul.f32 %v651_v44, %v651_v44  ;;  %v709_v63 = vld [vmem:[%s853_s0 + $0xa8] sm:$0xff]  ;;  %v194_v0 = vmul.f32 %v658_v46, %v658_v46 }
   0xa   :  { %v190_v1 = vmul.f32 %v663_v47, %v663_v47  ;;  %v718_v2 = vld [vmem:[%s853_s0 + $0xc8] sm:$0xff]  ;;  %v226_v3 = vadd.f32 %v186_v43, %v178_v40  ;;  %v183_v4 = vmul.f32 %v670_v49, %v670_v49  ;;  %v725_v5 = vld [vmem:[%s853_s0 + $0xb0] sm:$0xff]  ;;  %v195_v6 = vmul.f32 %v677_v51, %v677_v51  ;;  %v739_v10 = vld [vmem:[%s853_s0 + $0xb8] sm:$0xff] }
   0xb   :  { %v292_v16 = vrot.slane %v291_v15, 4  ;;  %v191_v7 = vmul.f32 %v684_v53, %v684_v53  ;;  %v734_v8 = vld [vmem:[%s853_s0 + $0xd0] sm:$0xff]  ;;  %v235_v9 = vadd.f32 %v187_v48, %v179_v45  ;;  %v196_v11 = vmul.f32 %v693_v57, %v693_v57  ;;  %v746_v12 = vld [vmem:[%s853_s0 + $0xd8] sm:$0xff] }
   0xc   :  { %v200_v13 = vmul.f32 %v702_v60, %v702_v60  ;;  %v209_v14 = vadd.f32 %v208_v55, %v192_v52  ;;  %v227_v31 = vadd.f32 %v226_v3, %v194_v0  ;;  %v262_v33 = vadd.f32 %v190_v1, %v182_v62  ;;  %v773_v38 = vld [vmem:[%s853_s0 + $0xf0] sm:$0xff]  ;;  %v780_v48 = vld [vmem:[%s853_s0 + $0xf8] sm:$0xff] }
   0xd   :  { %v293_v17 = vadd.f32 %v292_v16, %v291_v15  ;;  %v244_v15 = vadd.f32 %v188_v54, %v180_v50  ;;  %v197_v16 = vmul.f32 %v709_v63, %v709_v63  ;;  %v199_v35 = vmul.f32 %v739_v10, %v739_v10  ;;  %858 = vst [vmem:[#allocation3_spill] sm:$0xff] %v773_v38 }
   0xe   :  { %v203_v40 = vmul.f32 %v746_v12, %v746_v12  ;;  %v236_v43 = vadd.f32 %v235_v9, %v195_v6  ;;  %v271_v45 = vadd.f32 %v191_v7, %v183_v4  ;;  %859 = vst [vmem:[#allocation4_spill] sm:$0xff] %v780_v48  ;;  %v210_v52 = vadd.f32 %v209_v14, %v200_v13 }
   0xf   :  { %v294_v18 = vrot.slane %v293_v17, 2  ;;  %v245_v54 = vadd.f32 %v244_v15, %v196_v11  ;;  %v207_v0 = vmul.f32 %v780_v48, %v780_v48 }
  0x10   :  { %v237_v1 = vadd.f32 %v236_v43, %v203_v40  ;;  %v272_v3 = vadd.f32 %v271_v45, %v199_v35  ;;  %v211_v4 = vrot.slane %v210_v52, 4 }
  0x11   :  { %v295_v19 = vadd.f32 %v294_v18, %v293_v17  ;;  %v755_v17 = vld [vmem:[%s853_s0 + $0xe0] sm:$0xff]  ;;  %v201_v18 = vmul.f32 %v718_v2, %v718_v2 }
  0x12   :  { %v204_v50 = vmul.f32 %v755_v17, %v755_v17  ;;  %v238_v14 = vrot.slane %v237_v1, 4  ;;  %v273_v15 = vadd.f32 %v272_v3, %v207_v0 }
  0x13   :  { %v296_v20 = vrot.slane %v295_v19, 1 }
  0x14   :  { %v246_v6 = vadd.f32 %v245_v54, %v204_v50 }
  0x15   :  { %v297_v21 = vadd.f32 %v296_v20, %v295_v19  ;;  %v218_v19 = vadd.f32 %v217_v61, %v193_v58  ;;  %v253_v20 = vadd.f32 %v189_v59, %v181_v56  ;;  %v206_v59 = vmul.f32 %v773_v38, %v773_v38 }
  0x17   :  { %v314_v22 = vmax.f32 %v297_v21, 1e-16  ;;  %v198_v21 = vmul.f32 %v725_v5, %v725_v5  ;;  %v219_v56 = vadd.f32 %v218_v19, %v201_v18  ;;  %v254_v58 = vadd.f32 %v253_v20, %v197_v16 }
  0x18   :  { %v212_v18 = vadd.f32 %v211_v4, %v210_v52  ;;  %v247_v16 = vrot.slane %v246_v6, 4 }
  0x19   :  { %478 = vrsqrt.f32 %v314_v22  ;;  %v764_v22 = vld [vmem:[%s853_s0 + $0xe8] sm:$0xff]  ;;  %v263_v62 = vadd.f32 %v262_v33, %v198_v21  ;;  %v220_v7 = vrot.slane %v219_v56, 4  ;;  %v239_v21 = vadd.f32 %v238_v14, %v237_v1 }
  0x1a   :  { %v205_v55 = vmul.f32 %v764_v22, %v764_v22  ;;  %v213_v33 = vrot.slane %v212_v18, 2  ;;  %v248_v48 = vadd.f32 %v247_v16, %v246_v6 }
  0x1b   :  { %v264_v13 = vadd.f32 %v263_v62, %v206_v59  ;;  %v221_v19 = vadd.f32 %v220_v7, %v219_v56  ;;  %v240_v50 = vrot.slane %v239_v21, 2 }
  0x1c   :  { %v255_v9 = vadd.f32 %v254_v58, %v205_v55  ;;  %v214_v55 = vadd.f32 %v213_v33, %v212_v18  ;;  %v249_v58 = vrot.slane %v248_v48, 2 }
  0x1d   :  { %v222_v40 = vrot.slane %v221_v19, 2  ;;  %v241_v56 = vadd.f32 %v240_v50, %v239_v21 }
  0x1e   :  { %v256_v20 = vrot.slane %v255_v9, 4  ;;  %v250_v4 = vadd.f32 %v249_v58, %v248_v48 }
  0x1f   :  { %v223_v59 = vadd.f32 %v222_v40, %v221_v19  ;;  %v242_v14 = vrot.slane %v241_v56, 1 }
  0x20   :  { %v257_v35 = vadd.f32 %v256_v20, %v255_v9 }
  0x21   :  { %v224_v1 = vrot.slane %v223_v59, 1  ;;  %v243_v19 = vadd.f32 %v242_v14, %v241_v56 }
  0x22   :  { %v258_v62 = vrot.slane %v257_v35, 2 }
  0x23   :  { %v479_v23 = vpop.eup %478  ;;  %v225_v20 = vadd.f32 %v224_v1, %v223_v59 }
  0x24   :  { %326 = vperm.xlu0 %476, %v479_v23   ;;  %v202_v23 = vmul.f32 %v734_v8, %v734_v8  ;;  %v259_v7 = vadd.f32 %v258_v62, %v257_v35  ;;  %v301_v35 = vmax.f32 %v243_v19, 1e-16 }
  0x25   :  { %v299_v40 = vmax.f32 %v225_v20, 1e-16 }
  0x26   :  { %v228_v61 = vadd.f32 %v227_v31, %v202_v23  ;;  %v265_v23 = vrot.slane %v264_v13, 4  ;;  %v274_v31 = vrot.slane %v273_v15, 4 }
  0x28   :  { %v229_v11 = vrot.slane %v228_v61, 4  ;;  %v266_v45 = vadd.f32 %v265_v23, %v264_v13  ;;  %v275_v54 = vadd.f32 %v274_v31, %v273_v15  ;;  %v251_v13 = vrot.slane %v250_v4, 1 }
  0x29   :  { %v260_v15 = vrot.slane %v259_v7, 1 }
  0x2a   :  { %v230_v38 = vadd.f32 %v229_v11, %v228_v61  ;;  %v267_v0 = vrot.slane %v266_v45, 2  ;;  %v276_v3 = vrot.slane %v275_v54, 2  ;;  %v215_v61 = vrot.slane %v214_v55, 1 }
  0x2b   :  { %v261_v21 = vadd.f32 %v260_v15, %v259_v7 }
  0x2c   :  { %v231_v43 = vrot.slane %v230_v38, 2  ;;  %v268_v6 = vadd.f32 %v267_v0, %v266_v45  ;;  %v277_v9 = vadd.f32 %v276_v3, %v275_v54  ;;  %v216_v16 = vadd.f32 %v215_v61, %v214_v55 }
  0x2d   :  { %v303_v45 = vmax.f32 %v261_v21, 1e-16 }
  0x2e   :  { %v232_v52 = vadd.f32 %v231_v43, %v230_v38  ;;  %v269_v23 = vrot.slane %v268_v6, 1  ;;  %v278_v31 = vrot.slane %v277_v9, 1  ;;  %v252_v38 = vadd.f32 %v251_v13, %v250_v4 }
  0x2f   :  { %v298_v33 = vmax.f32 %v216_v16, 1e-16 }
  0x30   :  { %v233_v11 = vrot.slane %v232_v52, 1  ;;  %v270_v43 = vadd.f32 %v269_v23, %v268_v6  ;;  %v279_v50 = vadd.f32 %v278_v31, %v277_v9  ;;  %v302_v58 = vmax.f32 %v252_v38, 1e-16  ;;  %v861_v23 = vld [vmem:[#allocation4_spill] sm:$0xff] }
  0x31   :  { %480 = vrsqrt.f32 %v298_v33 }
  0x32   :  { %v234_v18 = vadd.f32 %v233_v11, %v232_v52  ;;  %482 = vrsqrt.f32 %v299_v40  ;;  %v304_v54 = vmax.f32 %v270_v43, 1e-16  ;;  %v305_v55 = vmax.f32 %v279_v50, 1e-16 }
  0x34   :  { %v300_v48 = vmax.f32 %v234_v18, 1e-16  ;;  %v860_v18 = vld [vmem:[#allocation3_spill] sm:$0xff] }
  0x36   :  { %484 = vrsqrt.f32 %v300_v48 }
  0x37   :  { %486 = vrsqrt.f32 %v301_v35 }
  0x38   :  { %488 = vrsqrt.f32 %v302_v58 }
  0x39   :  { %490 = vrsqrt.f32 %v303_v45 }
  0x3a   :  { %492 = vrsqrt.f32 %v304_v54 }
  0x3b   :  { %494 = vrsqrt.f32 %v305_v55  ;;  %v798_v11 = vpop.eup %480 }
  0x3c   :  { %v804_v14 = vpop.eup %482 }
  0x40   :  { %v810_v16 = vpop.eup %484 }
  0x41   :  { %v816_v13 = vpop.eup %486 }
  0x42   :  { %v822_v20 = vpop.eup %488 }
  0x43   :  { %v828_v15 = vpop.eup %490 }
  0x44   :  { %v834_v19 = vpop.eup %492 }
  0x45   :  { %v836_v33 = vpop.eup %494 }
  0x81   :  { %v55_v59 = vpop.permute.xlu0 %54  ;;  %v65_v62 = vpop.permute.xlu1 %64 }
  0x82   :  { %v72_v52 = vmul.f32 %v55_v59, %v569_v24  ;;  %v73_v0 = vmul.f32 %v55_v59, %v579_v26  ;;  %v74_v56 = vmul.f32 %v55_v59, %v589_v28  ;;  %v75_v3 = vmul.f32 %v55_v59, %v599_v30 }
  0x83   :  { %v76_v61 = vmul.f32 %v55_v59, %v613_v34  ;;  %v77_v4 = vmul.f32 %v55_v59, %v632_v39  ;;  %v78_v1 = vmul.f32 %v55_v59, %v651_v44  ;;  %v79_v7 = vmul.f32 %v55_v59, %v670_v49 }
  0x84   :  { %v88_v6 = vmul.f32 %v65_v62, %v620_v36  ;;  %v89_v24 = vmul.f32 %v65_v62, %v639_v41  ;;  %v90_v26 = vmul.f32 %v65_v62, %v658_v46  ;;  %v91_v28 = vmul.f32 %v65_v62, %v677_v51 }
  0x85   :  { %v92_v30 = vmul.f32 %v65_v62, %v693_v57  ;;  %v93_v34 = vmul.f32 %v65_v62, %v709_v63  ;;  %v94_v39 = vmul.f32 %v65_v62, %v725_v5  ;;  %v95_v44 = vmul.f32 %v65_v62, %v739_v10  ;;  %v60_v49 = vpop.permute.xlu0 %59  ;;  %v70_v9 = vpop.permute.xlu1 %69 }
  0x86   :  { %v80_v36 = vmul.f32 %v60_v49, %v574_v25  ;;  %v81_v41 = vmul.f32 %v60_v49, %v584_v27  ;;  %v82_v46 = vmul.f32 %v60_v49, %v594_v29  ;;  %v83_v51 = vmul.f32 %v60_v49, %v606_v32 }
  0x87   :  { %v84_v57 = vmul.f32 %v60_v49, %v625_v37  ;;  %v85_v63 = vmul.f32 %v60_v49, %v644_v42  ;;  %v86_v5 = vmul.f32 %v60_v49, %v663_v47  ;;  %v87_v10 = vmul.f32 %v60_v49, %v684_v53 }
  0x88   :  { %v96_v25 = vmul.f32 %v70_v9, %v702_v60  ;;  %v97_v27 = vmul.f32 %v70_v9, %v718_v2  ;;  %v98_v29 = vmul.f32 %v70_v9, %v734_v8  ;;  %v99_v32 = vmul.f32 %v70_v9, %v746_v12 }
  0x89   :  { %v100_v37 = vmul.f32 %v70_v9, %v755_v17  ;;  %v101_v42 = vmul.f32 %v70_v9, %v764_v22  ;;  %v102_v47 = vmul.f32 %v70_v9, %v860_v18  ;;  %v103_v53 = vmul.f32 %v70_v9, %v861_v23 }
  0x8a   :  { %v104_v31 = vadd.f32 %v80_v36, %v72_v52  ;;  %v113_v60 = vadd.f32 %v81_v41, %v73_v0  ;;  %v122_v38 = vadd.f32 %v82_v46, %v74_v56  ;;  %v131_v2 = vadd.f32 %v83_v51, %v75_v3 }
  0x8b   :  { %v140_v8 = vadd.f32 %v84_v57, %v76_v61  ;;  %v149_v12 = vadd.f32 %v85_v63, %v77_v4  ;;  %v158_v21 = vadd.f32 %v86_v5, %v78_v1  ;;  %v167_v40 = vadd.f32 %v87_v10, %v79_v7 }
  0x8c   :  { %v105_v43 = vadd.f32 %v104_v31, %v88_v6  ;;  %v114_v17 = vadd.f32 %v113_v60, %v89_v24  ;;  %v123_v48 = vadd.f32 %v122_v38, %v90_v26  ;;  %v132_v22 = vadd.f32 %v131_v2, %v91_v28 }
  0x8d   :  { %v141_v50 = vadd.f32 %v140_v8, %v92_v30  ;;  %v150_v35 = vadd.f32 %v149_v12, %v93_v34  ;;  %v159_v58 = vadd.f32 %v158_v21, %v94_v39  ;;  %v168_v45 = vadd.f32 %v167_v40, %v95_v44 }
  0x8e   :  { %v106_v54 = vadd.f32 %v105_v43, %v96_v25  ;;  %v115_v55 = vadd.f32 %v114_v17, %v97_v27  ;;  %v124_v59 = vadd.f32 %v123_v48, %v98_v29  ;;  %v133_v62 = vadd.f32 %v132_v22, %v99_v32 }
  0x8f   :  { %v142_v52 = vadd.f32 %v141_v50, %v100_v37  ;;  %v151_v0 = vadd.f32 %v150_v35, %v101_v42  ;;  %v160_v56 = vadd.f32 %v159_v58, %v102_v47  ;;  %v169_v3 = vadd.f32 %v168_v45, %v103_v53 }
  0x90   :  { %v107_v61 = vrot.slane %v106_v54, 4  ;;  %v116_v4 = vrot.slane %v115_v55, 4  ;;  %v125_v1 = vrot.slane %v124_v59, 4  ;;  %v134_v7 = vrot.slane %v133_v62, 4 }
  0x91   :  { %v143_v6 = vrot.slane %v142_v52, 4  ;;  %v152_v24 = vrot.slane %v151_v0, 4  ;;  %v161_v26 = vrot.slane %v160_v56, 4  ;;  %v170_v28 = vrot.slane %v169_v3, 4 }
  0x92   :  { %v108_v30 = vadd.f32 %v107_v61, %v106_v54  ;;  %v117_v34 = vadd.f32 %v116_v4, %v115_v55  ;;  %v126_v39 = vadd.f32 %v125_v1, %v124_v59  ;;  %v135_v44 = vadd.f32 %v134_v7, %v133_v62 }
  0x93   :  { %v144_v49 = vadd.f32 %v143_v6, %v142_v52  ;;  %v153_v9 = vadd.f32 %v152_v24, %v151_v0  ;;  %v162_v36 = vadd.f32 %v161_v26, %v160_v56  ;;  %v171_v41 = vadd.f32 %v170_v28, %v169_v3 }
  0x94   :  { %v109_v46 = vrot.slane %v108_v30, 2  ;;  %v118_v51 = vrot.slane %v117_v34, 2  ;;  %v127_v57 = vrot.slane %v126_v39, 2  ;;  %v136_v63 = vrot.slane %v135_v44, 2 }
  0x95   :  { %v145_v5 = vrot.slane %v144_v49, 2  ;;  %v154_v10 = vrot.slane %v153_v9, 2  ;;  %v163_v25 = vrot.slane %v162_v36, 2  ;;  %v172_v27 = vrot.slane %v171_v41, 2 }
  0x96   :  { %v110_v29 = vadd.f32 %v109_v46, %v108_v30  ;;  %v119_v32 = vadd.f32 %v118_v51, %v117_v34  ;;  %v128_v37 = vadd.f32 %v127_v57, %v126_v39  ;;  %v137_v42 = vadd.f32 %v136_v63, %v135_v44 }
  0x97   :  { %v146_v18 = vadd.f32 %v145_v5, %v144_v49  ;;  %v155_v47 = vadd.f32 %v154_v10, %v153_v9  ;;  %v164_v23 = vadd.f32 %v163_v25, %v162_v36  ;;  %v173_v53 = vadd.f32 %v172_v27, %v171_v41 }
  0x98   :  { %v111_v31 = vrot.slane %v110_v29, 1  ;;  %v120_v60 = vrot.slane %v119_v32, 1  ;;  %v129_v38 = vrot.slane %v128_v37, 1  ;;  %v138_v2 = vrot.slane %v137_v42, 1 }
  0x99   :  { %v147_v8 = vrot.slane %v146_v18, 1  ;;  %v156_v12 = vrot.slane %v155_v47, 1  ;;  %v165_v21 = vrot.slane %v164_v23, 1  ;;  %v174_v40 = vrot.slane %v173_v53, 1 }
  0x9a   :  { %v112_v43 = vadd.f32 %v111_v31, %v110_v29  ;;  %v121_v17 = vadd.f32 %v120_v60, %v119_v32  ;;  %v130_v48 = vadd.f32 %v129_v38, %v128_v37  ;;  %v139_v22 = vadd.f32 %v138_v2, %v137_v42 }
  0x9b   :  { %v148_v50 = vadd.f32 %v147_v8, %v146_v18  ;;  %v157_v35 = vadd.f32 %v156_v12, %v155_v47  ;;  %v166_v58 = vadd.f32 %v165_v21, %v164_v23  ;;  %v175_v45 = vadd.f32 %v174_v40, %v173_v53 }
  0x9c   :  { %v346_v54 = vstv %s345_s28  ;;  %v316_v55 = vmul.f32 %v798_v11, %v112_v43  ;;  %v317_v59 = vmul.f32 %v804_v14, %v121_v17  ;;  %v318_v62 = vmul.f32 %v810_v16, %v130_v48 }
  0x9d   :  { %v319_v52 = vmul.f32 %v816_v13, %v139_v22  ;;  %v320_v56 = vmul.f32 %v822_v20, %v148_v50  ;;  %v321_v3 = vmul.f32 %v828_v15, %v157_v35  ;;  %v322_v61 = vmul.f32 %v834_v19, %v166_v58 }
  0x9e   :  { %v323_v4 = vmul.f32 %v836_v33, %v175_v45  ;;  %v529_v8 = vmov 1966171168   ;;  %v418_v21 = vlaneseq }
  0x9f   :  { %v416_v12 = vunpack.c.l.s4 %v529_v8 }
  0xa0   :  { %v419_v58 = vshrl.u32 %v418_v21, 7 }
  0xa1   :  { %v417_v35 = vunpack.c.0.s8 %v416_v12 }
  0xa3   :  { %v327_v0 = vpop.permute.xlu0 %326 }
  0xa4   :  { %v329_v1 = vmul.f32 %v327_v0, %v316_v55  ;;  %v330_v7 = vmul.f32 %v327_v0, %v317_v59  ;;  %v331_v6 = vmul.f32 %v327_v0, %v318_v62  ;;  %v332_v24 = vmul.f32 %v327_v0, %v319_v52 }
  0xa5   :  { %v333_v11 = vmul.f32 %v327_v0, %v320_v56  ;;  %v334_v26 = vmul.f32 %v327_v0, %v321_v3  ;;  %v335_v14 = vmul.f32 %v327_v0, %v322_v61  ;;  %v336_v28 = vmul.f32 %v327_v0, %v323_v4 }
  0xa6   :  { %v337_v16 = vmul.f32 10.0, %v329_v1  ;;  %v338_v30 = vmul.f32 10.0, %v330_v7  ;;  %v339_v13 = vmul.f32 10.0, %v331_v6  ;;  %v340_v34 = vmul.f32 10.0, %v332_v24 }
  0xa7   :  { %v341_v39 = vmul.f32 10.0, %v333_v11  ;;  %v342_v20 = vmul.f32 10.0, %v334_v26  ;;  %v343_v44 = vmul.f32 10.0, %v335_v14  ;;  %v344_v15 = vmul.f32 10.0, %v336_v28 }
  0xa8   :  { %v347_v49 = vadd.f32 %v346_v54, %v337_v16  ;;  %v348_v19 = vadd.f32 %v346_v54, %v338_v30  ;;  %v349_v9 = vadd.f32 %v346_v54, %v339_v13  ;;  %v350_v33 = vadd.f32 %v346_v54, %v340_v34 }
  0xa9   :  { %v351_v36 = vadd.f32 %v346_v54, %v341_v39  ;;  %v352_v41 = vadd.f32 %v346_v54, %v342_v20  ;;  %v353_v46 = vadd.f32 %v346_v54, %v343_v44  ;;  %v354_v5 = vadd.f32 %v346_v54, %v344_v15 }
  0xaa   :  { %v466_v51 = vmul.f32 -1.442695, %v347_v49  ;;  %v467_v57 = vmul.f32 -1.442695, %v348_v19  ;;  %v468_v63 = vmul.f32 -1.442695, %v349_v9  ;;  %v420_v54 = vsub.s32 %v417_v35, %v419_v58 }
  0xab   :  { %v469_v10 = vmul.f32 -1.442695, %v350_v33  ;;  %v470_v25 = vmul.f32 -1.442695, %v351_v36  ;;  %v471_v27 = vmul.f32 -1.442695, %v352_v41 }
  0xac   :  { %496 = vpow2.f32 %v466_v51  ;;  %v472_v29 = vmul.f32 -1.442695, %v353_v46  ;;  %v473_v32 = vmul.f32 -1.442695, %v354_v5 }
  0xad   :  { %498 = vpow2.f32 %v467_v57 }
  0xae   :  { %500 = vpow2.f32 %v468_v63 }
  0xaf   :  { %502 = vpow2.f32 %v469_v10 }
  0xb0   :  { %504 = vpow2.f32 %v470_v25 }
  0xb1   :  { %506 = vpow2.f32 %v471_v27 }
  0xb2   :  { %508 = vpow2.f32 %v472_v29 }
  0xb3   :  { %510 = vpow2.f32 %v473_v32 }
  0xb6   :  { %v497_v37 = vpop.eup %496 }
  0xb7   :  { %v499_v42 = vpop.eup %498  ;;  %v379_v18 = vadd.f32 1.0, %v497_v37 }
  0xb8   :  { %v501_v47 = vpop.eup %500  ;;  %v380_v23 = vadd.f32 1.0, %v499_v42 }
  0xb9   :  { %v503_v53 = vpop.eup %502  ;;  %v381_v31 = vadd.f32 1.0, %v501_v47  ;;  %512 = vrcp.f32 %v379_v18 }
  0xba   :  { %v505_v60 = vpop.eup %504  ;;  %v382_v38 = vadd.f32 1.0, %v503_v53  ;;  %514 = vrcp.f32 %v380_v23 }
  0xbb   :  { %v507_v2 = vpop.eup %506  ;;  %v383_v40 = vadd.f32 1.0, %v505_v60  ;;  %516 = vrcp.f32 %v381_v31 }
  0xbc   :  { %v509_v43 = vpop.eup %508  ;;  %v384_v17 = vadd.f32 1.0, %v507_v2  ;;  %518 = vrcp.f32 %v382_v38 }
  0xbd   :  { %v511_v48 = vpop.eup %510  ;;  %v385_v22 = vadd.f32 1.0, %v509_v43  ;;  %520 = vrcp.f32 %v383_v40 }
  0xbe   :  { %v386_v50 = vadd.f32 1.0, %v511_v48  ;;  %522 = vrcp.f32 %v384_v17 }
  0xbf   :  { %524 = vrcp.f32 %v385_v22 }
  0xc0   :  { %526 = vrcp.f32 %v386_v50 }
  0xc3   :  { %v513_v45 = vpop.eup %512 }
  0xc4   :  { %v515_v55 = vpop.eup %514 }
  0xc5   :  { %v517_v59 = vpop.eup %516  ;;  %v411_v62 = vcombine.low %v513_v45, %v515_v55 }
  0xc6   :  { %v519_v52 = vpop.eup %518 }
  0xc7   :  { %v521_v0 = vpop.eup %520  ;;  %v412_v56 = vcombine.low %v517_v59, %v519_v52  ;;  %v421_v3 = vrot.slane %v411_v62, %v420_v54 }
  0xc8   :  { %v523_v61 = vpop.eup %522 }
  0xc9   :  { %v525_v4 = vpop.eup %524  ;;  %v413_v1 = vcombine.low %v521_v0, %v523_v61  ;;  %v428_v7 = vrot.slane %v412_v56, %v420_v54 }
  0xca   :  { %v527_v6 = vpop.eup %526 }
  0xcb   :  { %v414_v24 = vcombine.low %v525_v4, %v527_v6  ;;  %v435_v11 = vrot.slane %v413_v1, %v420_v54  ;;  %v443_v26 = vcombine.low %v421_v3, %v428_v7 }
  0xcd   :  { %v442_v14 = vrot.slane %v414_v24, %v420_v54  ;;  %v451_v16 = vrot.slane %v443_v26, %v420_v54 }
  0xcf   :  { %v444_v28 = vcombine.low %v435_v11, %v442_v14 }
  0xd1   :  { %v458_v30 = vrot.slane %v444_v28, %v420_v54 }
  0xd3   :  { %v459_v13 = vcombine.low %v451_v16, %v458_v30 }
  0xd5   :  { %461 = vst [vmem:[%s855_s3] sm:$0xff] %v459_v13 }

</bundles_post_ra>
